<compile_context>
chip_gen: v7x
topology: tpu7x:2x2x1
jax: 0.10.0
libtpu: 0.0.40
codegen_flags: <defaults>
</compile_context>

<pallas_src>
import functools
import math

import jax
import jax.numpy as jnp
from jax import lax
from jax.experimental import pallas as pl
from jax.experimental.pallas import tpu as pltpu


# ---------------------------------------------------------------------------
# Fused multi-head-attention kernel
# ---------------------------------------------------------------------------
def _fused_mha_kernel(q_ref, k_ref, v_ref, mask_ref,
                      wq_ref, bq_ref, wk_ref, bk_ref, wv_ref, bv_ref,
                      wfc_ref, bfc_ref, o_ref, *, n_head, d_k, d_v):
    f32 = jnp.float32
    bf16 = jnp.bfloat16

    q = q_ref[0]                                   # (TQ, d_model)  bf16
    k = k_ref[0]                                   # (Lk, d_model)  bf16
    v = v_ref[0]                                   # (Lk, d_model)  bf16
    masked = mask_ref[0].astype(f32) != 0.0        # (TQ, Lk) bool

    # Projections. w_qs/b_qs already carry the 1/sqrt(d_k) scale (folded at init).
    qp = jnp.dot(q, wq_ref[...], preferred_element_type=f32) + bq_ref[...]   # (TQ, H*dk)
    kp = jnp.dot(k, wk_ref[...], preferred_element_type=f32) + bk_ref[...]   # (Lk, H*dk)
    vp = jnp.dot(v, wv_ref[...], preferred_element_type=f32) + bv_ref[...]   # (Lk, H*dv)

    tq = q.shape[0]
    d_model_out = o_ref.shape[-1]
    acc = jnp.zeros((tq, d_model_out), f32)

    # TODO(synk): for very long sequences, tile Lk here with an online-softmax
    # (flash-style) loop so the (TQ, Lk) score tile stays within v7x's 64 MiB VMEM.
    for h in range(n_head):
        qh = qp[:, h * d_k:(h + 1) * d_k].astype(bf16)       # (TQ, dk)
        kh = kp[:, h * d_k:(h + 1) * d_k].astype(bf16)       # (Lk, dk)
        vh = vp[:, h * d_v:(h + 1) * d_v].astype(bf16)       # (Lk, dv)

        # scores = qh @ kh^T, contraction fed directly to the MXU (no transpose).
        s = lax.dot_general(qh, kh, (((1,), (1,)), ((), ())),
                            preferred_element_type=f32)       # (TQ, Lk)
        s = jnp.where(masked, jnp.float32(-1e30), s)

        s_max = jnp.max(s, axis=-1, keepdims=True)
        p = jnp.exp(s - s_max)
        denom = jnp.sum(p, axis=-1, keepdims=True)
        p = p * pl.reciprocal(denom, approx=True)             # EUP, frees VALU

        oh = jnp.dot(p.astype(bf16), vh, preferred_element_type=f32)   # (TQ, dv)

        # fc contribution of this head: equivalent to concat(heads) @ w_fc,
        # but without ever materializing / transposing the concatenated tensor.
        acc = acc + jnp.dot(oh.astype(bf16), wfc_ref[h * d_v:(h + 1) * d_v, :],
                            preferred_element_type=f32)

    o_ref[0] = (acc + bfc_ref[...]).astype(o_ref.dtype)


def fused_mha_pallas(q, k, v, mask,
                     wq, bq, wk, bk, wv, bv, wfc, bfc,
                     *, n_head, d_k, d_v, block_q=None):
    """Fully fused MHA forward.

    q/k/v : (B, L, d_model) bf16, mask : (B, Lq, Lk) int8 (nonzero = masked)
    weights in bf16 (wq already pre-scaled by 1/sqrt(d_k)), biases in f32 (1, d).
    Returns (B, Lq, d_model) f32.
    """
    sz_b, len_q, d_model_in = q.shape
    _, len_k, _ = k.shape
    _, len_v, _ = v.shape
    assert len_k == len_v, "key/value lengths must match"
    d_model_out = wfc.shape[1]

    if block_q is None or block_q >= len_q:
        block_q = len_q
    assert len_q % block_q == 0, "block_q must divide len_q"
    assert block_q == len_q or block_q % 8 == 0, "partial q-block must be 8-aligned"
    n_qb = len_q // block_q

    kernel = functools.partial(_fused_mha_kernel, n_head=n_head, d_k=d_k, d_v=d_v)

    return pl.pallas_call(
        kernel,
        grid=(sz_b, n_qb),
        in_specs=[
            pl.BlockSpec((1, block_q, d_model_in), lambda b, qb: (b, qb, 0)),   # q
            pl.BlockSpec((1, len_k, d_model_in),   lambda b, qb: (b, 0, 0)),    # k
            pl.BlockSpec((1, len_v, d_model_in),   lambda b, qb: (b, 0, 0)),    # v
            pl.BlockSpec((1, block_q, len_k),      lambda b, qb: (b, qb, 0)),   # mask
            pl.BlockSpec((d_model_in, n_head * d_k), lambda b, qb: (0, 0)),     # w_qs
            pl.BlockSpec((1, n_head * d_k),          lambda b, qb: (0, 0)),     # b_qs
            pl.BlockSpec((d_model_in, n_head * d_k), lambda b, qb: (0, 0)),     # w_ks
            pl.BlockSpec((1, n_head * d_k),          lambda b, qb: (0, 0)),     # b_ks
            pl.BlockSpec((d_model_in, n_head * d_v), lambda b, qb: (0, 0)),     # w_vs
            pl.BlockSpec((1, n_head * d_v),          lambda b, qb: (0, 0)),     # b_vs
            pl.BlockSpec((n_head * d_v, d_model_out), lambda b, qb: (0, 0)),    # w_fc
            pl.BlockSpec((1, d_model_out),            lambda b, qb: (0, 0)),    # b_fc
        ],
        out_specs=pl.BlockSpec((1, block_q, d_model_out), lambda b, qb: (b, qb, 0)),
        out_shape=jax.ShapeDtypeStruct((sz_b, len_q, d_model_out), jnp.float32),
        compiler_params=pltpu.CompilerParams(
            dimension_semantics=("parallel", "parallel"),
            # Defaults are fine at these shapes; raise vmem_limit_bytes for
            # large (block_q, len_k) score tiles.
        ),
    )(q, k, v, mask, wq, bq, wk, bk, wv, bv, wfc, bfc)


# ---------------------------------------------------------------------------
# Module: NodeMultiHeadAttentionFunc (forward pass)
# ---------------------------------------------------------------------------
class NodeMultiHeadAttentionFunc:
    def __init__(self, n_head, d_model, d_k, d_v, key, dropout=0.1):
        self.n_head = n_head
        self.d_k = d_k
        self.d_v = d_v
        self.d_model = d_model
        self.temperature = float(math.sqrt(d_k))

        k_qs, k_ks, k_vs, k_fc = jax.random.split(key, 4)
        std_qk = math.sqrt(2.0 / (d_model + d_k))
        std_v = math.sqrt(2.0 / (d_model + d_v))
        std_fc = math.sqrt(2.0 / (n_head * d_v + d_model))  # xavier_normal

        # Stored as (d_in, d_out) so projection is x @ W (+ b).
        self.w_qs = jax.random.normal(k_qs, (d_model, n_head * d_k), jnp.float32) * std_qk
        self.w_ks = jax.random.normal(k_ks, (d_model, n_head * d_k), jnp.float32) * std_qk
        self.w_vs = jax.random.normal(k_vs, (d_model, n_head * d_v), jnp.float32) * std_v
        self.w_fc = jax.random.normal(k_fc, (n_head * d_v, d_model), jnp.float32) * std_fc

        self.b_qs = jnp.zeros((n_head * d_k,), jnp.float32)
        self.b_ks = jnp.zeros((n_head * d_k,), jnp.float32)
        self.b_vs = jnp.zeros((n_head * d_v,), jnp.float32)
        self.b_fc = jnp.zeros((d_model,), jnp.float32)
        # TODO(synk): dropout (self.dropout / attention dropout) is identity (eval mode).

        # Pre-baked kernel operands:
        #  * 1/sqrt(d_k) folded into the Q projection (weights + bias).
        #  * matmul operands in bf16 (f32 accumulation inside the kernel).
        inv_t = 1.0 / self.temperature
        self._wq = (self.w_qs * inv_t).astype(jnp.bfloat16)
        self._bq = (self.b_qs * inv_t).reshape(1, -1)
        self._wk = self.w_ks.astype(jnp.bfloat16)
        self._bk = self.b_ks.reshape(1, -1)
        self._wv = self.w_vs.astype(jnp.bfloat16)
        self._bv = self.b_vs.reshape(1, -1)
        self._wfc = self.w_fc.astype(jnp.bfloat16)
        self._bfc = self.b_fc.reshape(1, -1)

    def __call__(self, t, q, k, v, mask):
        del t  # unused, exactly as in the reference forward
        mask_i8 = (mask != 0).astype(jnp.int8)   # (B, Lq, Lk), no n_head replication
        return fused_mha_pallas(
            q.astype(jnp.bfloat16), k.astype(jnp.bfloat16), v.astype(jnp.bfloat16),
            mask_i8,
            self._wq, self._bq, self._wk, self._bk, self._wv, self._bv,
            self._wfc, self._bfc,
            n_head=self.n_head, d_k=self.d_k, d_v=self.d_v)


# ---------------------------------------------------------------------------
if __name__ == "__main__":
    key = jax.random.PRNGKey(0)
    k_param, k_q, k_k, k_v = jax.random.split(key, 4)

    # Small shapes: batch=2, seq=8, d_model=32, n_head=2, d_k=d_v=16
    sz_b, seq, d_model = 2, 8, 32
    n_head, d_k, d_v = 2, 16, 16

    mha = NodeMultiHeadAttentionFunc(n_head, d_model, d_k, d_v, k_param)

    q = jax.random.normal(k_q, (sz_b, seq, d_model), jnp.float32)
    k = jax.random.normal(k_k, (sz_b, seq, d_model), jnp.float32)
    v = jax.random.normal(k_v, (sz_b, seq, d_model), jnp.float32)

    # Key-padding-style mask: nonzero => masked. Mask out the last 2 keys of batch 1.
    mask = jnp.zeros((sz_b, seq, seq), jnp.float32)
    mask = mask.at[1, :, seq - 2:].set(1.0)

    t = jnp.float32(0.0)  # unused time argument (NODE interface)

    out = mha(t, q, k, v, mask)
    out = jax.block_until_ready(out)

    assert out.shape == (sz_b, seq, d_model)
    assert bool(jnp.all(jnp.isfinite(out)))
    print("KERNEL_OK")
</pallas_src>

<mosaic_0001>
module attributes {stable_mosaic.version = 11 : i64} {
  func.func @_fused_mha_kernel(%arg0: i32, %arg1: i32, %arg2: memref<1x8x32xbf16, #tpu.memory_space<vmem>>, %arg3: memref<1x8x32xbf16, #tpu.memory_space<vmem>>, %arg4: memref<1x8x32xbf16, #tpu.memory_space<vmem>>, %arg5: memref<1x8x8xi8, #tpu.memory_space<vmem>>, %arg6: memref<32x32xbf16, #tpu.memory_space<vmem>>, %arg7: memref<1x32xf32, #tpu.memory_space<vmem>>, %arg8: memref<32x32xbf16, #tpu.memory_space<vmem>>, %arg9: memref<1x32xf32, #tpu.memory_space<vmem>>, %arg10: memref<32x32xbf16, #tpu.memory_space<vmem>>, %arg11: memref<1x32xf32, #tpu.memory_space<vmem>>, %arg12: memref<32x32xbf16, #tpu.memory_space<vmem>>, %arg13: memref<1x32xf32, #tpu.memory_space<vmem>>, %arg14: memref<1x8x32xf32, #tpu.memory_space<vmem>>) attributes {dimension_semantics = [#tpu.dimension_semantics<parallel>, #tpu.dimension_semantics<parallel>], iteration_bounds = array<i64: 2, 1>, scalar_prefetch = 0 : i64, scratch_operands = 0 : i64, tpu.core_type = #tpu.core_type<tc>, window_params = [{transform_indices = @transform_0, window_bounds = array<i64: 1, 8, 32>}, {transform_indices = @transform_1, window_bounds = array<i64: 1, 8, 32>}, {transform_indices = @transform_2, window_bounds = array<i64: 1, 8, 32>}, {transform_indices = @transform_3, window_bounds = array<i64: 1, 8, 8>}, {pipeline_mode = #tpu.pipeline_mode<synchronous>, transform_indices = @transform_4, window_bounds = array<i64: 32, 32>}, {pipeline_mode = #tpu.pipeline_mode<synchronous>, transform_indices = @transform_5, window_bounds = array<i64: 1, 32>}, {pipeline_mode = #tpu.pipeline_mode<synchronous>, transform_indices = @transform_6, window_bounds = array<i64: 32, 32>}, {pipeline_mode = #tpu.pipeline_mode<synchronous>, transform_indices = @transform_7, window_bounds = array<i64: 1, 32>}, {pipeline_mode = #tpu.pipeline_mode<synchronous>, transform_indices = @transform_8, window_bounds = array<i64: 32, 32>}, {pipeline_mode = #tpu.pipeline_mode<synchronous>, transform_indices = @transform_9, window_bounds = array<i64: 1, 32>}, {pipeline_mode = #tpu.pipeline_mode<synchronous>, transform_indices = @transform_10, window_bounds = array<i64: 32, 32>}, {pipeline_mode = #tpu.pipeline_mode<synchronous>, transform_indices = @transform_11, window_bounds = array<i64: 1, 32>}, {transform_indices = @transform_12, window_bounds = array<i64: 1, 8, 32>}]} {
    %c0 = arith.constant 0 : index
    %c0_0 = arith.constant 0 : index
    %c0_1 = arith.constant 0 : index
    %0 = vector.load %arg2[%c0, %c0_0, %c0_1] : memref<1x8x32xbf16, #tpu.memory_space<vmem>>, vector<1x8x32xbf16>
    %1 = vector.shape_cast %0 : vector<1x8x32xbf16> to vector<8x32xbf16>
    %c0_2 = arith.constant 0 : index
    %c0_3 = arith.constant 0 : index
    %c0_4 = arith.constant 0 : index
    %2 = vector.load %arg3[%c0_2, %c0_3, %c0_4] : memref<1x8x32xbf16, #tpu.memory_space<vmem>>, vector<1x8x32xbf16>
    %3 = vector.shape_cast %2 : vector<1x8x32xbf16> to vector<8x32xbf16>
    %c0_5 = arith.constant 0 : index
    %c0_6 = arith.constant 0 : index
    %c0_7 = arith.constant 0 : index
    %4 = vector.load %arg4[%c0_5, %c0_6, %c0_7] : memref<1x8x32xbf16, #tpu.memory_space<vmem>>, vector<1x8x32xbf16>
    %5 = vector.shape_cast %4 : vector<1x8x32xbf16> to vector<8x32xbf16>
    %c0_8 = arith.constant 0 : index
    %c0_9 = arith.constant 0 : index
    %c0_10 = arith.constant 0 : index
    %6 = vector.load %arg5[%c0_8, %c0_9, %c0_10] : memref<1x8x8xi8, #tpu.memory_space<vmem>>, vector<1x8x8xi8>
    %7 = vector.shape_cast %6 : vector<1x8x8xi8> to vector<8x8xi8>
    %8 = arith.sitofp %7 : vector<8x8xi8> to vector<8x8xf32>
    %cst = arith.constant 0.000000e+00 : f32
    %9 = vector.broadcast %cst : f32 to vector<8x8xf32>
    %10 = arith.cmpf one, %8, %9 : vector<8x8xf32>
    %c0_11 = arith.constant 0 : index
    %c0_12 = arith.constant 0 : index
    %11 = vector.load %arg6[%c0_11, %c0_12] : memref<32x32xbf16, #tpu.memory_space<vmem>>, vector<32x32xbf16>
    %cst_13 = arith.constant dense<0.000000e+00> : vector<8x32xf32>
    %12 = tpu.matmul %1, %11, %cst_13 {dimension_numbers = #tpu.dot_dimension_numbers<[1], [0], [0], [1], [0, 0, 1, 1], [], []>} : vector<8x32xbf16>, vector<32x32xbf16>, vector<8x32xf32> -> vector<8x32xf32>
    %c0_14 = arith.constant 0 : index
    %c0_15 = arith.constant 0 : index
    %13 = vector.load %arg7[%c0_14, %c0_15] : memref<1x32xf32, #tpu.memory_space<vmem>>, vector<1x32xf32>
    %14 = vector.broadcast %13 : vector<1x32xf32> to vector<8x32xf32>
    %15 = arith.addf %12, %14 : vector<8x32xf32>
    %c0_16 = arith.constant 0 : index
    %c0_17 = arith.constant 0 : index
    %16 = vector.load %arg8[%c0_16, %c0_17] : memref<32x32xbf16, #tpu.memory_space<vmem>>, vector<32x32xbf16>
    %cst_18 = arith.constant dense<0.000000e+00> : vector<8x32xf32>
    %17 = tpu.matmul %3, %16, %cst_18 {dimension_numbers = #tpu.dot_dimension_numbers<[1], [0], [0], [1], [0, 0, 1, 1], [], []>} : vector<8x32xbf16>, vector<32x32xbf16>, vector<8x32xf32> -> vector<8x32xf32>
    %c0_19 = arith.constant 0 : index
    %c0_20 = arith.constant 0 : index
    %18 = vector.load %arg9[%c0_19, %c0_20] : memref<1x32xf32, #tpu.memory_space<vmem>>, vector<1x32xf32>
    %19 = vector.broadcast %18 : vector<1x32xf32> to vector<8x32xf32>
    %20 = arith.addf %17, %19 : vector<8x32xf32>
    %c0_21 = arith.constant 0 : index
    %c0_22 = arith.constant 0 : index
    %21 = vector.load %arg10[%c0_21, %c0_22] : memref<32x32xbf16, #tpu.memory_space<vmem>>, vector<32x32xbf16>
    %cst_23 = arith.constant dense<0.000000e+00> : vector<8x32xf32>
    %22 = tpu.matmul %5, %21, %cst_23 {dimension_numbers = #tpu.dot_dimension_numbers<[1], [0], [0], [1], [0, 0, 1, 1], [], []>} : vector<8x32xbf16>, vector<32x32xbf16>, vector<8x32xf32> -> vector<8x32xf32>
    %c0_24 = arith.constant 0 : index
    %c0_25 = arith.constant 0 : index
    %23 = vector.load %arg11[%c0_24, %c0_25] : memref<1x32xf32, #tpu.memory_space<vmem>>, vector<1x32xf32>
    %24 = vector.broadcast %23 : vector<1x32xf32> to vector<8x32xf32>
    %25 = arith.addf %22, %24 : vector<8x32xf32>
    %cst_26 = arith.constant 0.000000e+00 : f32
    %26 = vector.broadcast %cst_26 : f32 to vector<8x32xf32>
    %27 = vector.extract_strided_slice %15 {offsets = [0, 0], sizes = [8, 16], strides = [1, 1]} : vector<8x32xf32> to vector<8x16xf32>
    %28 = arith.truncf %27 : vector<8x16xf32> to vector<8x16xbf16>
    %29 = vector.extract_strided_slice %20 {offsets = [0, 0], sizes = [8, 16], strides = [1, 1]} : vector<8x32xf32> to vector<8x16xf32>
    %30 = arith.truncf %29 : vector<8x16xf32> to vector<8x16xbf16>
    %31 = vector.extract_strided_slice %25 {offsets = [0, 0], sizes = [8, 16], strides = [1, 1]} : vector<8x32xf32> to vector<8x16xf32>
    %32 = arith.truncf %31 : vector<8x16xf32> to vector<8x16xbf16>
    %cst_27 = arith.constant dense<0.000000e+00> : vector<8x8xf32>
    %33 = tpu.matmul %28, %30, %cst_27 {dimension_numbers = #tpu.dot_dimension_numbers<[1], [1], [0], [0], [0, 0, 1, 0], [], []>} : vector<8x16xbf16>, vector<8x16xbf16>, vector<8x8xf32> -> vector<8x8xf32>
    %cst_28 = arith.constant -1.000000e+30 : f32
    %34 = vector.broadcast %cst_28 : f32 to vector<8x8xf32>
    %35 = arith.select %10, %34, %33 : vector<8x8xi1>, vector<8x8xf32>
    %cst_29 = arith.constant dense<0xFF800000> : vector<8xf32>
    %36 = vector.multi_reduction <maximumf>, %35, %cst_29 [1] : vector<8x8xf32> to vector<8xf32>
    %37 = vector.shape_cast %36 : vector<8xf32> to vector<8x1xf32>
    %38 = vector.broadcast %37 : vector<8x1xf32> to vector<8x8xf32>
    %39 = arith.subf %35, %38 : vector<8x8xf32>
    %40 = math.exp %39 : vector<8x8xf32>
    %cst_30 = arith.constant dense<0.000000e+00> : vector<8xf32>
    %41 = vector.multi_reduction <add>, %40, %cst_30 [1] : vector<8x8xf32> to vector<8xf32>
    %42 = vector.shape_cast %41 : vector<8xf32> to vector<8x1xf32>
    %43 = tpu.reciprocal %42 {approx = true} : vector<8x1xf32> -> vector<8x1xf32>
    %44 = vector.broadcast %43 : vector<8x1xf32> to vector<8x8xf32>
    %45 = arith.mulf %40, %44 : vector<8x8xf32>
    %46 = arith.truncf %45 : vector<8x8xf32> to vector<8x8xbf16>
    %cst_31 = arith.constant dense<0.000000e+00> : vector<8x16xf32>
    %47 = tpu.matmul %46, %32, %cst_31 {dimension_numbers = #tpu.dot_dimension_numbers<[1], [0], [0], [1], [0, 0, 1, 1], [], []>} : vector<8x8xbf16>, vector<8x16xbf16>, vector<8x16xf32> -> vector<8x16xf32>
    %48 = arith.truncf %47 : vector<8x16xf32> to vector<8x16xbf16>
    %c0_32 = arith.constant 0 : index
    %c0_33 = arith.constant 0 : index
    %49 = vector.load %arg12[%c0_32, %c0_33] : memref<32x32xbf16, #tpu.memory_space<vmem>>, vector<16x32xbf16>
    %cst_34 = arith.constant dense<0.000000e+00> : vector<8x32xf32>
    %50 = tpu.matmul %48, %49, %cst_34 {dimension_numbers = #tpu.dot_dimension_numbers<[1], [0], [0], [1], [0, 0, 1, 1], [], []>} : vector<8x16xbf16>, vector<16x32xbf16>, vector<8x32xf32> -> vector<8x32xf32>
    %51 = arith.addf %26, %50 : vector<8x32xf32>
    %52 = vector.extract_strided_slice %15 {offsets = [0, 16], sizes = [8, 16], strides = [1, 1]} : vector<8x32xf32> to vector<8x16xf32>
    %53 = arith.truncf %52 : vector<8x16xf32> to vector<8x16xbf16>
    %54 = vector.extract_strided_slice %20 {offsets = [0, 16], sizes = [8, 16], strides = [1, 1]} : vector<8x32xf32> to vector<8x16xf32>
    %55 = arith.truncf %54 : vector<8x16xf32> to vector<8x16xbf16>
    %56 = vector.extract_strided_slice %25 {offsets = [0, 16], sizes = [8, 16], strides = [1, 1]} : vector<8x32xf32> to vector<8x16xf32>
    %57 = arith.truncf %56 : vector<8x16xf32> to vector<8x16xbf16>
    %cst_35 = arith.constant dense<0.000000e+00> : vector<8x8xf32>
    %58 = tpu.matmul %53, %55, %cst_35 {dimension_numbers = #tpu.dot_dimension_numbers<[1], [1], [0], [0], [0, 0, 1, 0], [], []>} : vector<8x16xbf16>, vector<8x16xbf16>, vector<8x8xf32> -> vector<8x8xf32>
    %cst_36 = arith.constant -1.000000e+30 : f32
    %59 = vector.broadcast %cst_36 : f32 to vector<8x8xf32>
    %60 = arith.select %10, %59, %58 : vector<8x8xi1>, vector<8x8xf32>
    %cst_37 = arith.constant dense<0xFF800000> : vector<8xf32>
    %61 = vector.multi_reduction <maximumf>, %60, %cst_37 [1] : vector<8x8xf32> to vector<8xf32>
    %62 = vector.shape_cast %61 : vector<8xf32> to vector<8x1xf32>
    %63 = vector.broadcast %62 : vector<8x1xf32> to vector<8x8xf32>
    %64 = arith.subf %60, %63 : vector<8x8xf32>
    %65 = math.exp %64 : vector<8x8xf32>
    %cst_38 = arith.constant dense<0.000000e+00> : vector<8xf32>
    %66 = vector.multi_reduction <add>, %65, %cst_38 [1] : vector<8x8xf32> to vector<8xf32>
    %67 = vector.shape_cast %66 : vector<8xf32> to vector<8x1xf32>
    %68 = tpu.reciprocal %67 {approx = true} : vector<8x1xf32> -> vector<8x1xf32>
    %69 = vector.broadcast %68 : vector<8x1xf32> to vector<8x8xf32>
    %70 = arith.mulf %65, %69 : vector<8x8xf32>
    %71 = arith.truncf %70 : vector<8x8xf32> to vector<8x8xbf16>
    %cst_39 = arith.constant dense<0.000000e+00> : vector<8x16xf32>
    %72 = tpu.matmul %71, %57, %cst_39 {dimension_numbers = #tpu.dot_dimension_numbers<[1], [0], [0], [1], [0, 0, 1, 1], [], []>} : vector<8x8xbf16>, vector<8x16xbf16>, vector<8x16xf32> -> vector<8x16xf32>
    %73 = arith.truncf %72 : vector<8x16xf32> to vector<8x16xbf16>
    %c16 = arith.constant 16 : index
    %c0_40 = arith.constant 0 : index
    %74 = vector.load %arg12[%c16, %c0_40] : memref<32x32xbf16, #tpu.memory_space<vmem>>, vector<16x32xbf16>
    %cst_41 = arith.constant dense<0.000000e+00> : vector<8x32xf32>
    %75 = tpu.matmul %73, %74, %cst_41 {dimension_numbers = #tpu.dot_dimension_numbers<[1], [0], [0], [1], [0, 0, 1, 1], [], []>} : vector<8x16xbf16>, vector<16x32xbf16>, vector<8x32xf32> -> vector<8x32xf32>
    %76 = arith.addf %51, %75 : vector<8x32xf32>
    %c0_42 = arith.constant 0 : index
    %c0_43 = arith.constant 0 : index
    %77 = vector.load %arg13[%c0_42, %c0_43] : memref<1x32xf32, #tpu.memory_space<vmem>>, vector<1x32xf32>
    %78 = vector.broadcast %77 : vector<1x32xf32> to vector<8x32xf32>
    %79 = arith.addf %76, %78 : vector<8x32xf32>
    %c0_44 = arith.constant 0 : index
    %c0_45 = arith.constant 0 : index
    %c0_46 = arith.constant 0 : index
    %80 = vector.load %arg14[%c0_44, %c0_45, %c0_46] : memref<1x8x32xf32, #tpu.memory_space<vmem>>, vector<1x8x32xf32>
    %81 = vector.shape_cast %80 : vector<1x8x32xf32> to vector<8x32xf32>
    %82 = vector.shape_cast %79 : vector<8x32xf32> to vector<1x8x32xf32>
    tpu.vector_store %arg14[%c0_44, %c0_45, %c0_46], %82 {strides = array<i32>} : memref<1x8x32xf32, #tpu.memory_space<vmem>>, vector<1x8x32xf32>,
    return
  }
  func.func @transform_0(%arg0: i32, %arg1: i32) -> (i32, i32, i32) {
    %c0_i32 = arith.constant 0 : i32
    %c0_i32_0 = arith.constant 0 : i32
    return %arg0, %arg1, %c0_i32 : i32, i32, i32
  }
  func.func @transform_1(%arg0: i32, %arg1: i32) -> (i32, i32, i32) {
    %c0_i32 = arith.constant 0 : i32
    %c0_i32_0 = arith.constant 0 : i32
    %c0_i32_1 = arith.constant 0 : i32
    return %arg0, %c0_i32, %c0_i32_0 : i32, i32, i32
  }
  func.func @transform_2(%arg0: i32, %arg1: i32) -> (i32, i32, i32) {
    %c0_i32 = arith.constant 0 : i32
    %c0_i32_0 = arith.constant 0 : i32
    %c0_i32_1 = arith.constant 0 : i32
    return %arg0, %c0_i32, %c0_i32_0 : i32, i32, i32
  }
  func.func @transform_3(%arg0: i32, %arg1: i32) -> (i32, i32, i32) {
    %c0_i32 = arith.constant 0 : i32
    %c0_i32_0 = arith.constant 0 : i32
    return %arg0, %arg1, %c0_i32 : i32, i32, i32
  }
  func.func @transform_4(%arg0: i32, %arg1: i32) -> (i32, i32) {
    %c0_i32 = arith.constant 0 : i32
    %c0_i32_0 = arith.constant 0 : i32
    %c0_i32_1 = arith.constant 0 : i32
    return %c0_i32, %c0_i32_0 : i32, i32
  }
  func.func @transform_5(%arg0: i32, %arg1: i32) -> (i32, i32) {
    %c0_i32 = arith.constant 0 : i32
    %c0_i32_0 = arith.constant 0 : i32
    %c0_i32_1 = arith.constant 0 : i32
    return %c0_i32, %c0_i32_0 : i32, i32
  }
  func.func @transform_6(%arg0: i32, %arg1: i32) -> (i32, i32) {
    %c0_i32 = arith.constant 0 : i32
    %c0_i32_0 = arith.constant 0 : i32
    %c0_i32_1 = arith.constant 0 : i32
    return %c0_i32, %c0_i32_0 : i32, i32
  }
  func.func @transform_7(%arg0: i32, %arg1: i32) -> (i32, i32) {
    %c0_i32 = arith.constant 0 : i32
    %c0_i32_0 = arith.constant 0 : i32
    %c0_i32_1 = arith.constant 0 : i32
    return %c0_i32, %c0_i32_0 : i32, i32
  }
  func.func @transform_8(%arg0: i32, %arg1: i32) -> (i32, i32) {
    %c0_i32 = arith.constant 0 : i32
    %c0_i32_0 = arith.constant 0 : i32
    %c0_i32_1 = arith.constant 0 : i32
    return %c0_i32, %c0_i32_0 : i32, i32
  }
  func.func @transform_9(%arg0: i32, %arg1: i32) -> (i32, i32) {
    %c0_i32 = arith.constant 0 : i32
    %c0_i32_0 = arith.constant 0 : i32
    %c0_i32_1 = arith.constant 0 : i32
    return %c0_i32, %c0_i32_0 : i32, i32
  }
  func.func @transform_10(%arg0: i32, %arg1: i32) -> (i32, i32) {
    %c0_i32 = arith.constant 0 : i32
    %c0_i32_0 = arith.constant 0 : i32
    %c0_i32_1 = arith.constant 0 : i32
    return %c0_i32, %c0_i32_0 : i32, i32
  }
  func.func @transform_11(%arg0: i32, %arg1: i32) -> (i32, i32) {
    %c0_i32 = arith.constant 0 : i32
    %c0_i32_0 = arith.constant 0 : i32
    %c0_i32_1 = arith.constant 0 : i32
    return %c0_i32, %c0_i32_0 : i32, i32
  }
  func.func @transform_12(%arg0: i32, %arg1: i32) -> (i32, i32, i32) {
    %c0_i32 = arith.constant 0 : i32
    %c0_i32_0 = arith.constant 0 : i32
    return %arg0, %arg1, %c0_i32 : i32, i32, i32
  }
}

</mosaic_0001>

<bundles_post_ra>
// kernel: tpu_custom_call.1
= control target key start
LH: loop header
LB: loop body
LE: loop exit
PB: predicated region body
PF: predicated region fallthrough
CT: control target
= control target key end

     0   :  { %s2436_s0 = inlined_call_operand.hbm [shape: bf16[2,8,32], index: 0, kind: input, shape index: {}]   ;;  %s2437_s1 = inlined_call_operand.hbm [shape: bf16[2,8,32], index: 1, kind: input, shape index: {}]   ;;  %s2438_s2 = inlined_call_operand.hbm [shape: bf16[2,8,32], index: 2, kind: input, shape index: {}]   ;;  %s2439_s3 = inlined_call_operand.hbm [shape: s8[2,8,8], index: 3, kind: input, shape index: {}]   ;;  %s2440_s4 = inlined_call_operand.hbm [shape: bf16[32,32], index: 4, kind: input, shape index: {}]   ;;  %s2441_s5 = inlined_call_operand.vmem [shape: f32[1,32], index: 5, kind: input, shape index: {}]   ;;  %s2442_s6 = inlined_call_operand.vmem [shape: bf16[32,32], index: 6, kind: input, shape index: {}]   ;;  %s2443_s7 = inlined_call_operand.vmem [shape: f32[1,32], index: 7, kind: input, shape index: {}]   ;;  %s2444_s8 = inlined_call_operand.hbm [shape: bf16[32,32], index: 8, kind: input, shape index: {}]   ;;  %s2445_s9 = inlined_call_operand.hbm [shape: f32[1,32], index: 9, kind: input, shape index: {}]   ;;  %s2446_s10 = inlined_call_operand.vmem [shape: bf16[32,32], index: 10, kind: input, shape index: {}]   ;;  %s2447_s11 = inlined_call_operand.vmem [shape: f32[1,32], index: 11, kind: input, shape index: {}]   ;;  %s2448_s12 = inlined_call_operand.hbm [shape: f32[2,8,32], index: 12, kind: output, shape index: {}]  }
   0x1   :  { %2467 = sst [smem:[#allocation28_spill]] %s2437_s1 }
   0x2   :  { %2468 = sst [smem:[#allocation29_spill]] %s2440_s4 }
   0x3   :  { %2469 = sst [smem:[#allocation30_spill]] %s2441_s5 }
   0x4   :  { %2470 = sst [smem:[#allocation31_spill]] %s2443_s7 }
   0x5   :  { %2471 = sst [smem:[#allocation32_spill]] %s2444_s8 }
   0x6   :  { %2472 = sst [smem:[#allocation33_spill]] %s2446_s10 }
   0x7   :  { %2473 = sst [smem:[#allocation34_spill]] %s2447_s11 }
   0x8   :  { %2474 = sst [smem:[#allocation35_spill]] %s2448_s12 }
   0x9   :  { %17 = vsyncpa [#allocation3], 0 }
   0xa   :  { %19 = vsyncpa [#allocation3 + $0x1], 0 }
   0xb   :  { %20 = vsyncpa [#allocation6], 0 }
   0xc   :  { %22 = vsyncpa [#allocation6 + $0x1], 0 }
   0xd   :  { %23 = vsyncpa [#allocation9], 0 }
   0xe   :  { %25 = vsyncpa [#allocation9 + $0x1], 0 }
   0xf   :  { %26 = vsyncpa [#allocation12], 0 }
  0x10   :  { %27 = vsyncpa [#allocation4], 0 }
  0x11   :  { %29 = vsyncpa [#allocation4 + $0x1], 0  ;;  %s1974_s21 = smov 0   ;;  %s1976_s22 = smov 0  }
  0x12   :  { %s1978_s23 = smov 0   ;;  %s1980_s24 = smov 0  }
  0x13   :  { %s1982_s25 = smov 0   ;;  %s1984_s26 = smov 0  }
  0x14 LB: > { %2475 = sst [smem:[#allocation21_spill]] %s1874_s21  ;;  %s2005_s27 = sadd.s32 4294967295, %s1894_s26   ;;  %s1894_s26 = sphi %s1984_s26, %s35_s26   ;;  %s1890_s25 = sphi %s1982_s25, %s2524_s25   ;;  %s1886_s24 = sphi %s1980_s24, %s2523_s24   ;;  %s1882_s23 = sphi %s1978_s23, %s2519_s23   ;;  %s1878_s22 = sphi %s1976_s22, %s2522_s22   ;;  %s1874_s21 = sphi %s1974_s21, %s2521_s21  }
  0x15   : > { %2476 = sst [smem:[#allocation22_spill]] %s1882_s23  ;;  %s1334_s28 = sadd.s32 4294967294, %s1894_s26  }
  0x16   : > { %2477 = sst [smem:[#allocation23_spill]] %s1886_s24  ;;  %p69_p0 = scmp.ne.s32.totalorder %s1878_s22, %s1874_s21 }
  0x17   : > { %p2452_p1 = scmp.eq.s32.totalorder %s2005_s27, 0  ;;  %p349_p3 = scmp.eq.s32.totalorder %s1334_s28, 1 }
  0x18   : > { %p1335_p5 = scmp.ge.s32.totalorder %s1894_s26, 1  ;;  %p356_p7 = scmp.lt.s32.totalorder %s1894_s26, 3 }
  0x19   : > { %p2014_p4 = por %p2452_p1, %p69_p0  ;;  %p2019_p6 = por %p349_p3, %p69_p0 }
  0x1a   : > { %p2024_p8 = pnand %p1335_p5, %p356_p7  ;;  %s1896_s14 = smov [#allocation10]  }
  0x1b   : > { %s2478_s29 = scalar_select %p2014_p4, 1, 0 }
  0x1c   : > { %s2479_s30 = scalar_select %p2019_p6, 1, 0 }
  0x1d   : > { %s2481_s13 = scalar_select %p2024_p8, 1, 0 }
  0x1e   : > { %2480 = sst [smem:[#allocation24_spill]] %s2479_s30  ;;  %s368_s15 = sshll.u32 %s1896_s14, 4  ;;  %s2028_s15 = int_to_ptr.vmem [resolvable:$true] %s368_s15 }
  0x1f   : > { %p1485_p9 = pneg %p2024_p8  ;;  %s1897_s17 = smov [#allocation11]  }
  0x20   : > { %s390_s18 = sshll.u32 %s1897_s17, 4  ;;  %s2483_s4 = sld [smem:[#allocation29_spill]]  ;;  %s2039_s18 = int_to_ptr.vmem [resolvable:$true] %s390_s18 }
  0x21   : > { %p2035_p11 = pnand %p1485_p9, %p2452_p1 }
  0x23   : > { %s2482_s16 = scalar_select %p2035_p11, 1, 0 }
  0x24   : > { %p2049_p13 = pneg %p2035_p11 }
  0x26   : > { %s1592_s28 = scalar_lea.hbm %s2483_s4, 256 }
  0x27   : > { %p1593_p12 = scmp.ne.s32.totalorder %s2483_s4, %s1592_s28  ;;  %p1599_p5 = scmp.lt.u32.totalorder %s1592_s28, %s2483_s4 }
  0x28   : > { %s2484_s21 = scalar_select %p2049_p13, 1, 0 }
  0x29   : > { %p1595_p0 = pnand %p2049_p13, %p1593_p12 }
  0x2b   : > { %p1596_p3 = pneg %p1595_p0 }
  0x2d   : > { %p1601_p7 = pnand %p1599_p5, %p1596_p3 }
  0x2f   : > { %1604 = shalt.err (!%p1601_p7)
}
  0x30   : > { %s1605_s30 = scalar_lea.vmem %s2028_s15, 256  ;;  %p1613_p2 = scmp.lt.s32.totalorder %s2028_s15, %s2028_s15 }
  0x31   : > { %p1606_p9 = scmp.ne.s32.totalorder %s2028_s15, %s1605_s30  ;;  %p1614_p6 = scmp.lt.s32.totalorder %s1605_s30, %s1605_s30 }
  0x33   : > { %p1608_p10 = pnand %p1606_p9, %p2049_p13  ;;  %p1615_p12 = por %p1614_p6, %p1613_p2 }
  0x35   : > { %p1609_p1 = pneg %p1608_p10 }
  0x37   : > { %p1616_p0 = pnand %p1615_p12, %p1609_p1 }
  0x39   : > { %1619 = shalt.err (!%p1616_p0)
}
  0x3a   : > { %s1898_s19 = smov 64   ;;  %s1899_s12 = smov 4  }
  0x3b   : > { %1488 = dma.hbm_to_vmem [thread:$0]  (!%p2035_p11), %s2483_s4, 256, %s2028_s15, [#allocation9], %s1898_s19, %s1898_s19, %s1899_s12  }
  0x3c   : > { %s2485_s8 = sld [smem:[#allocation32_spill]] }
  0x42   : > { %s1620_s11 = scalar_lea.hbm %s2485_s8, 256 }
  0x43   : > { %p1621_p2 = scmp.ne.s32.totalorder %s2485_s8, %s1620_s11  ;;  %p1627_p10 = scmp.lt.u32.totalorder %s1620_s11, %s2485_s8 }
  0x45   : > { %p1623_p1 = pnand %p1621_p2, %p2049_p13 }
  0x47   : > { %p1624_p6 = pneg %p1623_p1 }
  0x49   : > { %p1629_p3 = pnand %p1627_p10, %p1624_p6 }
  0x4b   : > { %1632 = shalt.err (!%p1629_p3)
}
  0x4c   : > { %s1633_s15 = scalar_lea.vmem %s2039_s18, 256  ;;  %p1641_p12 = scmp.lt.s32.totalorder %s2039_s18, %s2039_s18 }
  0x4d   : > { %p1634_p5 = scmp.ne.s32.totalorder %s2039_s18, %s1633_s15  ;;  %p1642_p0 = scmp.lt.s32.totalorder %s1633_s15, %s1633_s15 }
  0x4f   : > { %p1636_p7 = pnand %p1634_p5, %p2049_p13  ;;  %p1643_p2 = por %p1642_p0, %p1641_p12 }
  0x51   : > { %p1637_p9 = pneg %p1636_p7 }
  0x53   : > { %p1644_p1 = pnand %p1643_p2, %p1637_p9 }
  0x55   : > { %1647 = shalt.err (!%p1644_p1)
}
  0x56   : > { %1491 = dma.hbm_to_vmem [thread:$0]  (!%p2035_p11), %s2485_s8, 256, %s2039_s18, [#allocation12], %s1898_s19, %s1898_s19, %s1899_s12  }
  0x57   : > { %s47_s11 = sadd.s32 1, %s1890_s25  ;;  %s56_s24 = sadd.s32 1, %s1882_s23 }
  0x58   : > { %p49_p6 = scmp.ge.s32.totalorder %s47_s11, 2  ;;  %p63_p10 = scmp.ne.s32.totalorder %s1882_s23, %s1878_s22 }
  0x59   : > { %p64_p3 = scmp.eq.s32.totalorder %s1894_s26, 0  ;;  %p1515_p5 = scmp.lt.s32.totalorder %s1894_s26, 2 }
  0x5a   : > { %s2526_s11 = smov (%p49_p6, %s47_s11), 0  ;;  %p2487_p9 = scmp.eq.s32.totalorder %s2005_s27, 1 }
  0x5b   : > { %2486 = sst [smem:[#allocation25_spill]] %s2526_s11  ;;  %p65_p7 = por %p64_p3, %p63_p10 }
  0x5c   : > { %p2103_p12 = por %p2487_p9, %p63_p10  ;;  %s51_s28 = ssub.s32 %s1890_s25, %s2526_s11 }
  0x5d   : > { %s2110_s18 = sand.u32 1, %s1882_s23   ;;  %p54_p0 = scmp.eq.s32.totalorder %s51_s28, 0 }
  0x5e   : > { %s2488_s20 = scalar_select %p2103_p12, 1, 0 }
  0x5f   : > { %s2113_s19 = sshll.u32 %s2110_s18, 2  ;;  %s2116_s12 = sshll.u32 %s1890_s25, 6 }
  0x60   : > { %2489 = sst [smem:[#allocation26_spill]] %s2488_s20  ;;  %p2118_p2 = pnand %p1515_p5, %p65_p7 }
  0x61   : > { %s2123_s17 = scalar_select %p54_p0, %s1882_s23, %s56_s24  }
  0x62   : > { %s2490_s14 = scalar_select %p2118_p2, 1, 0 }
  0x63   : > { %2491 = sst [smem:[#allocation27_spill]] %s2123_s17  ;;  %s2458_s30 = sand.u32 1, %s1894_s26  }
  0x64   : > { %s2492_s1 = sld [smem:[#allocation28_spill]]  ;;  %s444_s28 = scalar_lea.vmem [#allocation5], %s2113_s19 }
  0x65   : > { %s451_s4 = sshll.u32 %s444_s28, 4  ;;  %s2137_s8 = scalar_lea.sflag [#allocation6], %s2458_s30  ;;  %s2133_s4 = int_to_ptr.vmem [resolvable:$true] %s451_s4 }
  0x66   : > { %p2143_p6 = pneg %p2118_p2 }
  0x6a   : > { %s2130_s10 = scalar_lea.hbm %s2492_s1, %s2116_s12  ;;  %s1653_s28 = scalar_lea.hbm %s2492_s1, 128 }
  0x6b   : > { %s1648_s11 = scalar_lea.hbm %s2130_s10, 64  ;;  %p1654_p5 = scmp.lt.u32.totalorder %s2130_s10, %s2492_s1 }
  0x6c   : > { %p1649_p1 = scmp.ne.s32.totalorder %s2130_s10, %s1648_s11  ;;  %p1655_p7 = scmp.lt.u32.totalorder %s1653_s28, %s1648_s11 }
  0x6d   : > { %p1657_p0 = scmp.lt.u32.totalorder %s1648_s11, %s2130_s10 }
  0x6e   : > { %p1651_p10 = pnand %p2143_p6, %p1649_p1  ;;  %p1656_p9 = por %p1655_p7, %p1654_p5 }
  0x70   : > { %p1652_p3 = pneg %p1651_p10  ;;  %p1658_p12 = por %p1657_p0, %p1656_p9 }
  0x72   : > { %p1659_p4 = pnand %p1658_p12, %p1652_p3 }
  0x74   : > { %1662 = shalt.err (!%p1659_p4)
}
  0x75   : > { %s1663_s30 = scalar_lea.vmem %s2133_s4, 64  ;;  %s1900_s15 = smov [#allocation5]  }
  0x76   : > { %p1664_p1 = scmp.ne.s32.totalorder %s2133_s4, %s1663_s30  ;;  %s1668_s5 = sshll.u32 %s1900_s15, 4  ;;  %s1669_s5 = int_to_ptr.vmem [resolvable:$false] %s1668_s5 }
  0x77   : > { %s1670_s23 = scalar_lea.vmem %s1669_s5, 128  ;;  %p1671_p11 = scmp.lt.s32.totalorder %s2133_s4, %s1669_s5 }
  0x78   : > { %p1666_p10 = pnand %p1664_p1, %p2143_p6  ;;  %p1672_p13 = scmp.lt.s32.totalorder %s1670_s23, %s1663_s30 }
  0x7a   : > { %p1667_p8 = pneg %p1666_p10  ;;  %p1673_p5 = por %p1672_p13, %p1671_p11 }
  0x7c   : > { %p1674_p7 = pnand %p1673_p5, %p1667_p8 }
  0x7e   : > { %1677 = shalt.err (!%p1674_p7)
}
  0x7f   : > { %1501 = dma.hbm_to_vmem [thread:$0]  (!%p2118_p2), %s2130_s10, 64, %s2133_s4, %s2137_s8  }
  0x80   : > { %s1901_s11 = smov [#allocation13]   ;;  %s2171_s1 = scalar_lea.hbm %s2436_s0, %s2116_s12 }
  0x81   : > { %s404_s17 = sshll.u32 %s1901_s11, 4  ;;  %s1678_s23 = scalar_lea.hbm %s2445_s9, 16  ;;  %s405_s17 = int_to_ptr.vmem [resolvable:$true] %s404_s17 }
  0x82   : > { %p1679_p4 = scmp.ne.s32.totalorder %s2445_s9, %s1678_s23  ;;  %p2494_p8 = scmp.ne.s32.totalorder %s2484_s21, 0 }
  0x83   : > { %p1685_p12 = scmp.lt.u32.totalorder %s1678_s23, %s2445_s9 }
  0x84   : > { %p1681_p11 = pnand %p1679_p4, %p2494_p8 }
  0x86   : > { %p1682_p13 = pneg %p1681_p11 }
  0x88   : > { %p1687_p3 = pnand %p1685_p12, %p1682_p13 }
  0x8a   : > { %1690 = shalt.err (!%p1687_p3)
}
  0x8b   : > { %s1691_s11 = scalar_lea.vmem %s405_s17, 16  ;;  %s1698_s28 = scalar_lea.vmem %s405_s17, 32 }
  0x8c   : > { %p1692_p9 = scmp.ne.s32.totalorder %s405_s17, %s1691_s11  ;;  %p1699_p10 = scmp.lt.s32.totalorder %s405_s17, %s405_s17 }
  0x8d   : > { %p1700_p5 = scmp.lt.s32.totalorder %s1698_s28, %s1691_s11 }
  0x8e   : > { %p1694_p0 = pnand %p1692_p9, %p2494_p8 }
  0x8f   : > { %p1701_p7 = por %p1700_p5, %p1699_p10 }
  0x90   : > { %p1695_p1 = pneg %p1694_p0 }
  0x92   : > { %p1702_p2 = pnand %p1701_p7, %p1695_p1 }
  0x94   : > { %1705 = shalt.err (!%p1702_p2)
}
  0x95   : > { %p2495_p4 = scmp.ne.s32.totalorder %s2482_s16, 0  ;;  %s425_s21 = scalar_lea.vmem [#allocation2], %s2113_s19 }
  0x96   : > { %s433_s15 = sshll.u32 %s425_s21, 4  ;;  %s2198_s16 = scalar_lea.hbm %s2438_s2, %s2116_s12  ;;  %s2192_s15 = int_to_ptr.vmem [resolvable:$true] %s433_s15 }
  0x97   : > { %1494 = dma.hbm_to_vmem [thread:$0]  (!%p2495_p4), %s2445_s9, 16, %s405_s17, [#allocation12]  }
  0x98   : > { %s422_s23 = scalar_lea.sflag [#allocation3], %s2110_s18  ;;  %s1706_s4 = scalar_lea.hbm %s2171_s1, 64 }
  0x99   : > { %p1707_p2 = scmp.ne.s32.totalorder %s2171_s1, %s1706_s4  ;;  %s1711_s28 = scalar_lea.hbm %s2436_s0, 128 }
  0x9a   : > { %p1712_p13 = scmp.lt.u32.totalorder %s2171_s1, %s2436_s0  ;;  %p1713_p12 = scmp.lt.u32.totalorder %s1711_s28, %s1706_s4 }
  0x9b   : > { %p1709_p8 = pnand %p1707_p2, %p2143_p6  ;;  %p1715_p9 = scmp.lt.u32.totalorder %s1706_s4, %s2171_s1 }
  0x9c   : > { %p1714_p3 = por %p1713_p12, %p1712_p13 }
  0x9d   : > { %p1710_p11 = pneg %p1709_p8 }
  0x9e   : > { %p1716_p0 = por %p1715_p9, %p1714_p3 }
  0xa0   : > { %p1717_p1 = pnand %p1716_p0, %p1710_p11 }
  0xa2   : > { %1720 = shalt.err (!%p1717_p1)
}
  0xa3   : > { %s1721_s12 = scalar_lea.vmem %s2192_s15, 64  ;;  %s1902_s20 = smov [#allocation2]  }
  0xa4   : > { %p1722_p10 = scmp.ne.s32.totalorder %s2192_s15, %s1721_s12  ;;  %s1726_s21 = sshll.u32 %s1902_s20, 4  ;;  %s1727_s21 = int_to_ptr.vmem [resolvable:$false] %s1726_s21 }
  0xa5   : > { %s1728_s30 = scalar_lea.vmem %s1727_s21, 128  ;;  %p1729_p4 = scmp.lt.s32.totalorder %s2192_s15, %s1727_s21 }
  0xa6   : > { %p1724_p5 = pnand %p1722_p10, %p2143_p6  ;;  %p1730_p2 = scmp.lt.s32.totalorder %s1728_s30, %s1721_s12 }
  0xa8   : > { %p1725_p7 = pneg %p1724_p5  ;;  %p1731_p8 = por %p1730_p2, %p1729_p4 }
  0xaa   : > { %p1732_p13 = pnand %p1731_p8, %p1725_p7 }
  0xac   : > { %1735 = shalt.err (!%p1732_p13)
}
  0xad   : > { %p2496_p11 = scmp.ne.s32.totalorder %s2490_s14, 0  ;;  %s462_s5 = scalar_lea.vmem [#allocation7], %s2113_s19 }
  0xae   : > { %s469_s4 = sshll.u32 %s462_s5, 4  ;;  %s1346_s10 = sshll.u32 %s2110_s18, 1  ;;  %s470_s4 = int_to_ptr.vmem [resolvable:$true] %s469_s4 }
  0xaf   : > { %1498 = dma.hbm_to_vmem [thread:$0]  (!%p2496_p11), %s2171_s1, 64, %s2192_s15, %s422_s23  }
  0xb0   : > { %s1736_s11 = scalar_lea.hbm %s2198_s16, 64  ;;  %s1741_s7 = scalar_lea.hbm %s2438_s2, 128 }
  0xb1   : > { %p1737_p12 = scmp.ne.s32.totalorder %s2198_s16, %s1736_s11  ;;  %p1742_p0 = scmp.lt.u32.totalorder %s2198_s16, %s2438_s2 }
  0xb2   : > { %p1743_p1 = scmp.lt.u32.totalorder %s1741_s7, %s1736_s11  ;;  %p1745_p5 = scmp.lt.u32.totalorder %s1736_s11, %s2198_s16 }
  0xb3   : > { %p1739_p3 = pnand %p1737_p12, %p2143_p6 }
  0xb4   : > { %p1744_p10 = por %p1743_p1, %p1742_p0 }
  0xb5   : > { %p1740_p9 = pneg %p1739_p3 }
  0xb6   : > { %p1746_p7 = por %p1745_p5, %p1744_p10 }
  0xb8   : > { %p1747_p4 = pnand %p1746_p7, %p1740_p9 }
  0xba   : > { %1750 = shalt.err (!%p1747_p4)
}
  0xbb   : > { %s1751_s1 = scalar_lea.vmem %s470_s4, 64  ;;  %s1903_s19 = smov [#allocation7]  }
  0xbc   : > { %p1752_p2 = scmp.ne.s32.totalorder %s470_s4, %s1751_s1  ;;  %s1756_s15 = sshll.u32 %s1903_s19, 4  ;;  %s1757_s15 = int_to_ptr.vmem [resolvable:$false] %s1756_s15 }
  0xbd   : > { %s1758_s23 = scalar_lea.vmem %s1757_s15, 128  ;;  %p1759_p12 = scmp.lt.s32.totalorder %s470_s4, %s1757_s15 }
  0xbe   : > { %p1754_p8 = pnand %p1752_p2, %p2143_p6  ;;  %p1760_p3 = scmp.lt.s32.totalorder %s1758_s23, %s1751_s1 }
  0xc0   : > { %p1755_p13 = pneg %p1754_p8  ;;  %p1761_p11 = por %p1760_p3, %p1759_p12 }
  0xc2   : > { %p1762_p0 = pnand %p1761_p11, %p1755_p13 }
  0xc4   : > { %1765 = shalt.err (!%p1762_p0)
}
  0xc5   : > { %p2497_p1 = scmp.ne.s32.totalorder %s2490_s14, 0  ;;  %s1347_s21 = sshll.u32 %s1890_s25, 5 }
  0xc6   : > { %s480_s30 = scalar_lea.vmem [#allocation8], %s1346_s10  ;;  %s2248_s17 = scalar_lea.hbm %s2439_s3, %s1347_s21 }
  0xc7   : > { %1504 = dma.hbm_to_vmem [thread:$0]  (!%p2497_p1), %s2198_s16, 64, %s470_s4, %s2137_s8  }
  0xc8   : > { %s488_s5 = sshll.u32 %s480_s30, 4  ;;  %s2498_s7 = sand.u32 1, %s1894_s26   ;;  %s489_s5 = int_to_ptr.vmem [resolvable:$true] %s488_s5 }
  0xc9   : > { %s477_s12 = scalar_lea.sflag [#allocation9], %s2498_s7  ;;  %s1766_s20 = scalar_lea.hbm %s2248_s17, 32 }
  0xca   : > { %p1767_p11 = scmp.ne.s32.totalorder %s2248_s17, %s1766_s20  ;;  %s1771_s16 = scalar_lea.hbm %s2439_s3, 64 }
  0xcb   : > { %p1772_p5 = scmp.lt.u32.totalorder %s2248_s17, %s2439_s3  ;;  %p1773_p7 = scmp.lt.u32.totalorder %s1771_s16, %s1766_s20 }
  0xcc   : > { %p1769_p9 = pnand %p1767_p11, %p2143_p6  ;;  %p1775_p2 = scmp.lt.u32.totalorder %s1766_s20, %s2248_s17 }
  0xcd   : > { %p1774_p4 = por %p1773_p7, %p1772_p5 }
  0xce   : > { %p1770_p10 = pneg %p1769_p9 }
  0xcf   : > { %p1776_p8 = por %p1775_p2, %p1774_p4 }
  0xd1   : > { %p1777_p13 = pnand %p1776_p8, %p1770_p10 }
  0xd3   : > { %1780 = shalt.err (!%p1777_p13)
}
  0xd4   : > { %s1781_s1 = scalar_lea.vmem %s489_s5, 32  ;;  %s1904_s19 = smov [#allocation8]  }
  0xd5   : > { %p1782_p12 = scmp.ne.s32.totalorder %s489_s5, %s1781_s1  ;;  %s1786_s15 = sshll.u32 %s1904_s19, 4  ;;  %s1787_s15 = int_to_ptr.vmem [resolvable:$false] %s1786_s15 }
  0xd6   : > { %s1788_s23 = scalar_lea.vmem %s1787_s15, 64  ;;  %p1789_p11 = scmp.lt.s32.totalorder %s489_s5, %s1787_s15 }
  0xd7   : > { %p1784_p3 = pnand %p1782_p12, %p2143_p6  ;;  %p1790_p9 = scmp.lt.s32.totalorder %s1788_s23, %s1781_s1 }
  0xd9   : > { %p1785_p0 = pneg %p1784_p3  ;;  %p1791_p1 = por %p1790_p9, %p1789_p11 }
  0xdb   : > { %p1792_p5 = pnand %p1791_p1, %p1785_p0 }
  0xdd   : > { %1795 = shalt.err (!%p1792_p5)
}
  0xde   : > { %p2499_p7 = scmp.ne.s32.totalorder %s2490_s14, 0  ;;  %p2500_p10 = scmp.ne.s32.totalorder %s2481_s13, 0 }
  0xdf   : > { %s2272_s24 = sand.u32 (!%p2500_p10), 1, %s1878_s22   ;;  %p2501_p6 = scmp.ne.s32.totalorder (!%p2500_p10), %s2478_s29, 0 }
  0xe0   : > { %1507 = dma.hbm_to_vmem [thread:$0]  (!%p2499_p7), %s2248_s17, 32, %s489_s5, %s477_s12  }
  0xe1   : > { %497 = sbr.rel (%p2500_p10) target bundleno = 1567 (0x61f), region = 68  ;;  %s2275_s21 = sshll.u32 (!%p2500_p10), %s2272_s24, 2 }
  0xe2   : > { %s500_s30 = scalar_lea.sflag (!%p2500_p10), [#allocation3], %s2272_s24  ;;  %s503_s11 = scalar_lea.vmem (!%p2500_p10), [#allocation2], %s2275_s21 }
  0xe8   : > { %1849 = dma.done.wait (%p2501_p6), %s500_s30, 64  }
  0xe9   : > { %1851 = vsyncadd (%p2501_p6), %s500_s30, 4294967232  ;;  %s508_s13 = sand.u32 1, %s2005_s27   ;;  %s512_s5 = scalar_lea.vmem [#allocation5], %s2275_s21 }
  0xea   : > { %s509_s14 = scalar_lea.sflag [#allocation6], %s508_s13 }
  0xeb   : > { %1853 = dma.done.wait (%p2501_p6), %s509_s14, 128  }
  0xec   : > { %1855 = vsyncadd (%p2501_p6), %s509_s14, 4294967168  ;;  %s1352_s28 = sshll.u32 %s2272_s24, 1  ;;  %s521_s17 = scalar_lea.vmem [#allocation7], %s2275_s21 }
  0xed   : > { %s527_s7 = scalar_lea.sflag [#allocation9], %s508_s13  ;;  %s2291_s12 = scalar_lea.vmem [#allocation8], %s1352_s28 }
  0xee   : > { %1857 = dma.done.wait (%p2501_p6), %s527_s7, 32  }
  0xef   : > { %1859 = vsyncadd (%p2501_p6), %s527_s7, 4294967264  ;;  %p2502_p1 = scmp.eq.s32.totalorder %s2005_s27, 0 }
  0xf1   : > { %1861 = dma.done.wait (%p2502_p1), [#allocation9], 256   ;;  %p2503_p4 = pmov %p2502_p1 }
  0xf2   : > { %p2504_p2 = pmov %p2502_p1 }
  0xf3   : > { %1863 = vsyncadd (%p2503_p4), [#allocation9], 4294967040 }
  0xf4   : > { %1865 = dma.done.wait (%p2504_p2), [#allocation12], 272   ;;  %p2505_p8 = pmov %p2502_p1 }
  0xf5   : > { %v1905_v0 = vmov 0.0   ;;  %vm1906_vm0 = vmmov 0   ;;  %v1576_v1 = vld [vmem:[%s2442_s6] sm:$0xff]   ;;  %v1577_v2 = vld [vmem:[%s2442_s6 + $0x8] sm:$0xff]   ;;  %vm629_vm1 = vcmask 261120   ;;  %s2506_s4 = sld [smem:[#allocation31_spill]] }
  0xf6   : > { %1867 = vsyncadd (%p2505_p8), [#allocation12], 4294967024  ;;  %1411 = vmatprep.subr.bf16.mxu1 %v1905_v0  ;;  %1403 = vmatprep.subr.bf16.mxu0 %v1905_v0  ;;  %v1578_v3 = vld [vmem:[#allocation10] sm:$0xff]   ;;  %v600_v4 = vld [vmem:[%s512_s5] sm:$0xf]  ;;  %s2507_s19 = sld [smem:[#allocation30_spill]] }
  0xf7   : > { %1415 = vmatprep.mubr.msk.bf16.mxu1 %vm1906_vm0, %v1905_v0  ;;  %1407 = vmatprep.mubr.msk.bf16.mxu0 %vm1906_vm0, %v1905_v0  ;;  %v1579_v5 = vld [vmem:[#allocation10 + $0x8] sm:$0xff]   ;;  %vm808_vm2 = vcmask 130048   ;;  %s1907_s15 = smov 112   ;;  %v1580_v22 = vld [vmem:[#allocation11] sm:$0xff]   ;;  %v1581_v23 = vld [vmem:[#allocation11 + $0x8] sm:$0xff]   ;;  %vm856_vm4 = vcmask 64512  }
  0xf8   : > { %1412 = vmatpush3.bf16.msra.mxu1 %v1576_v1  ;;  %1404 = vmatpush3.bf16.msra.mxu0 %v1578_v3  ;;  %v599_v6 = vld [vmem:[%s503_s11] sm:$0xf]  ;;  %v601_v24 = vld [vmem:[%s521_s17] sm:$0xf]  ;;  %v602_v28 = vld [vmem:[%s2291_s12] sm:$0x3] }
  0xf9   : > { %1413 = vmatprep.subr.bf16.mxu1 %v1905_v0  ;;  %1405 = vmatprep.subr.bf16.mxu0 %v1905_v0  ;;  %v603_v29 = vunpack.c.0.s8 %v602_v28  ;;  %v1365_v51 = vld [vmem:[#allocation13] ss:$0 sm:$0xff]  ;;  %vm872_vm5 = vcmask 1043456   ;;  %s2508_s30 = sld [smem:[#allocation33_spill]]  ;;  %s2509_s14 = sld [smem:[#allocation23_spill]] }
  0xfa   : > { %s1356_s5 = sshll.u32 %s2272_s24, 3  ;;  %s2510_s7 = sld [smem:[#allocation34_spill]] }
  0xfb   : > { %v1361_v7 = vld [vmem:[%s2506_s4] ss:$0 sm:$0xff]  ;;  %v604_v30 = vcvt.s32.f32 %v603_v29  ;;  %s2511_s12 = sld [smem:[#allocation26_spill]]  ;;  %s597_s20 = scalar_lea.vmem [#allocation14], %s1356_s5 }
  0xfc   : > { %1414 = vmatpush3.bf16.msra.mxu1 %v1577_v2  ;;  %1406 = vmatpush3.bf16.msra.mxu0 %v1579_v5  ;;  %v1357_v9 = vld [vmem:[%s2507_s19] ss:$0 sm:$0xff]  ;;  %s1158_s8 = sshll.u32 %s597_s20, 4  ;;  %s2512_s16 = sld [smem:[#allocation35_spill]]  ;;  %s2388_s8 = int_to_ptr.vmem [resolvable:$true] %s1158_s8 }
  0xfd   : > { %1427 = vmatprep.subr.bf16.mxu1 %v1905_v0  ;;  %1419 = vmatprep.subr.bf16.mxu0 %v1905_v0  ;;  %vm605_vm3 = vcmp.ne.f32.partialorder %v604_v30, 0.0  ;;  %s1144_s10 = scalar_lea.sflag [#allocation4], %s2272_s24  ;;  %s1796_s1 = scalar_lea.vmem %s2388_s8, 128 }
  0xfe   : > { %p1797_p13 = scmp.ne.s32.totalorder %s2388_s8, %s1796_s1  ;;  %s1908_s19 = smov [#allocation14]  }
  0xff   : > { %1416 = vmatmul.mubr.msk.bf16.vlgmr.msra.gmra.mrb[0].mxu1 %vm629_vm1, %v600_v4  ;;  %1408 = vmatmul.mubr.msk.bf16.vlgmr.msra.gmra.mrb[0].mxu0 %vm629_vm1, %v599_v6  ;;  %v1583_v2 = vld [vmem:[%s2508_s30 + $0x8] sm:$0xff]   ;;  %s1379_s29 = sshll.u32 %s2509_s14, 7 }
 0x100   : > { %1429 = vmatprep.mubr.msk.bf16.mxu1 %vm1906_vm0, %v1905_v0  ;;  %1423 = vmatprep.mubr.msk.bf16.mxu0 %vm1906_vm0, %v1905_v0 }
 0x101   : > { %1420 = vmatpush3.bf16.msra.mxu0 %v1580_v22  ;;  %p2513_p12 = scmp.ne.s32.totalorder %s2511_s12, 0 }
 0x102   : > { %1421 = vmatprep.subr.bf16.mxu0 %v1905_v0  ;;  %s2386_s4 = scalar_lea.hbm %s2512_s16, %s1379_s29 }
 0x103   : > { %p1798_p3 = pnand %p1797_p13, %p2513_p12 }
 0x105   : > { %1422 = vmatpush3.bf16.msra.mxu0 %v1581_v23  ;;  %p1799_p0 = pneg %p1798_p3 }
 0x106   : > { %1433 = vmatprep.subr.bf16.mxu0 %v1905_v0 }
 0x108   : > { %1424 = vmatmul.mubr.msk.bf16.vlgmr.msra.gmra.mrb[4].mxu0 %vm629_vm1, %v601_v24  ;;  %v1377_v24 = vld [vmem:[%s2510_s7] ss:$0 sm:$0xff] }
 0x109   : > { %1435 = vmatprep.mubr.msk.bf16.mxu0 %vm1906_vm0, %v1905_v0 }
 0x1d2   : > { %v733_v8 = vpop.f32.mrb[0].mxu1  ;;  %v667_v13 = vpop.f32.mrb[0].mxu0 }
 0x1d3   : > { %v734_v10 = vadd.f32 %v1361_v7, %v733_v8  ;;  %v1417_v11 = vpop.f32.mrb[1].mxu1  ;;  %v668_v16 = vadd.f32 %v1357_v9, %v667_v13  ;;  %v1409_v17 = vpop.f32.mrb[1].mxu0  ;;  %v1582_v8 = vld [vmem:[%s2508_s30] sm:$0xff]  }
 0x1d4   : > { %v736_v12 = vpop.f32.mrb[2].mxu1  ;;  %v670_v18 = vpop.f32.mrb[2].mxu0 }
 0x1d5   : > { %v806_v14 = vpack.c.bf16 %v734_v10, %v734_v10  ;;  %v1418_v15 = vpop.f32.mrb[3].mxu1  ;;  %v805_v20 = vpack.c.bf16 %v668_v16, %v668_v16  ;;  %v1410_v21 = vpop.f32.mrb[3].mxu0 }
 0x1d7   : > { %v813_v19 = vsel %vm808_vm2, %v806_v14, 0  ;;  %923 = vrot.lane.b32.xlu0 %v806_v14, %s1907_s15 }
 0x1d8   : > { %1428 = vmatpush3.bf16.xpose.msra.mxu1 %v813_v19 }
 0x1d9   : > { %1439 = vmatprep.subr.bf16.mxu1 %v1905_v0 }
 0x1db   : > { %920 = vrot.lane.b32.xlu0 %v805_v20, %s1907_s15  ;;  %v799_v48 = vpop.f32.mrb[4].mxu0 }
 0x1dc   : > { %v1425_v49 = vpop.f32.mrb[5].mxu0  ;;  %v800_v53 = vadd.f32 %v1365_v51, %v799_v48 }
 0x1dd   : > { %v802_v50 = vpop.f32.mrb[6].mxu0 }
 0x1de   : > { %v1426_v52 = vpop.f32.mrb[7].mxu0  ;;  %v807_v54 = vpack.c.bf16 %v800_v53, %v800_v53 }
 0x1df   : > { %1430 = vmatmul.mubr.msk.bf16.vlgmr.msra.gmra.mrb[4].mxu1 %vm808_vm2, %v805_v20 }
 0x1e0   : > { %1441 = vmatprep.mubr.msk.bf16.mxu1 %vm1906_vm0, %v1905_v0  ;;  %v874_v55 = vsel %vm872_vm5, %v807_v54, 0 }
 0x1e1   : > { %1434 = vmatpush3.bf16.msra.mxu0 %v874_v55 }
 0x1e2   : > { %1445 = vmatprep.subr.bf16.mxu0 %v1905_v0 }
 0x249   : > { %v924_v25 = vpop.permute.xlu0 %923 }
 0x24a   : > { %v929_v26 = vsel %vm808_vm2, %v924_v25, 0 }
 0x24b   : > { %1440 = vmatpush3.bf16.xpose.msra.mxu1 %v929_v26 }
 0x24c   : > { %1451 = vmatprep.subr.bf16.mxu1 %v1905_v0 }
 0x24d   : > { %v921_v27 = vpop.permute.xlu0 %920 }
 0x252   : > { %1442 = vmatmul.mubr.msk.bf16.vlgmr.msra.gmra.mrb[8].mxu1 %vm808_vm2, %v921_v27 }
 0x253   : > { %1453 = vmatprep.mubr.msk.bf16.mxu1 %vm1906_vm0, %v1905_v0  ;;  %1452 = vmatpush3.bf16.msra.mxu1 %v1583_v2 }
 0x2b2   : > { %v849_v31 = vpop.f32.mrb[4].mxu1 }
 0x2b3   : > { %v855_v32 = vsel %vm605_vm3, -1e+30, %v849_v31  ;;  %v1431_v33 = vpop.f32.mrb[5].mxu1 }
 0x2b4   : > { %v852_v34 = vpop.f32.mrb[6].mxu1  ;;  %v857_v35 = vsel %vm856_vm4, %v855_v32, -inf }
 0x2b5   : > { %858 = vmax.xlane.f32.xlu1 %v857_v35  ;;  %v1432_v36 = vpop.f32.mrb[7].mxu1 }
 0x325   : > { %v965_v37 = vpop.f32.mrb[8].mxu1 }
 0x326   : > { %v971_v38 = vsel %vm605_vm3, -1e+30, %v965_v37  ;;  %v1443_v39 = vpop.f32.mrb[9].mxu1 }
 0x327   : > { %v968_v40 = vpop.f32.mrb[10].mxu1  ;;  %v972_v41 = vsel %vm856_vm4, %v971_v38, -inf }
 0x328   : > { %973 = vmax.xlane.f32.xlu1 %v972_v41  ;;  %v1444_v42 = vpop.f32.mrb[11].mxu1 }
 0x342   : > { %v859_v43 = vpop.xlane.xlu1 %858 }
 0x343   : > { %v860_v44 = vsub.f32 %v855_v32, %v859_v43 }
 0x345   : > { %v861_v45 = vmul.f32 1.442695, %v860_v44 }
 0x347   : > { %1584 = vpow2.f32 %v861_v45 }
 0x351   : > { %v1585_v46 = vpop.eup %1584 }
 0x352   : > { %v863_v47 = vsel %vm856_vm4, %v1585_v46, 0.0 }
 0x353   : > { %864 = vadd.xlane.f32.xlu0 %v863_v47 }
 0x3b5   : > { %v974_v56 = vpop.xlane.xlu1 %973 }
 0x3b6   : > { %v975_v57 = vsub.f32 %v971_v38, %v974_v56 }
 0x3b8   : > { %v976_v58 = vmul.f32 1.442695, %v975_v57 }
 0x3ba   : > { %1586 = vpow2.f32 %v976_v58 }
 0x3c4   : > { %v1587_v59 = vpop.eup %1586 }
 0x3c5   : > { %v978_v60 = vsel %vm856_vm4, %v1587_v59, 0.0 }
 0x3c6   : > { %979 = vadd.xlane.f32.xlu1 %v978_v60 }
 0x3d7   : > { %985 = vrot.lane.b32.xlu1 %v807_v54, %s1907_s15  ;;  %s1800_s15 = sshll.u32 %s1908_s19, 4  ;;  %s1801_s15 = int_to_ptr.vmem [resolvable:$false] %s1800_s15 }
 0x3d8   : > { %s1802_s23 = scalar_lea.vmem %s1801_s15, 256  ;;  %p1803_p11 = scmp.lt.s32.totalorder %s2388_s8, %s1801_s15 }
 0x3d9   : > { %p1804_p9 = scmp.lt.s32.totalorder %s1802_s23, %s1796_s1 }
 0x3db   : > { %p1805_p5 = por %p1804_p9, %p1803_p11 }
 0x3dd   : > { %p1806_p7 = pnand %p1805_p5, %p1799_p0 }
 0x3e0   : > { %v865_v61 = vpop.xlane.xlu0 %864 }
 0x3e1   : > { %1588 = vrcp.f32 %v865_v61 }
 0x3eb   : > { %v1589_v62 = vpop.eup %1588 }
 0x3ec   : > { %v867_v63 = vmul.f32 %v1589_v62, %v1585_v46 }
 0x3ee   : > { %v868_v1 = vpack.c.bf16 %v867_v63, %v867_v63 }
 0x3f0   : > { %1436 = vmatmul.mubr.msk.bf16.vlgmr.msra.gmra.mrb[8].mxu0 %vm856_vm4, %v868_v1 }
 0x3f1   : > { %1447 = vmatprep.mubr.msk.bf16.mxu0 %vm1906_vm0, %v1905_v0 }
 0x453   : > { %v980_v3 = vpop.xlane.xlu1 %979 }
 0x454   : > { %1590 = vrcp.f32 %v980_v3 }
 0x457   : > { %v986_v4 = vpop.permute.xlu1 %985 }
 0x458   : > { %v991_v5 = vsel %vm872_vm5, %v986_v4, 0 }
 0x459   : > { %1446 = vmatpush3.bf16.msra.mxu0 %v991_v5 }
 0x45a   : > { %1457 = vmatprep.subr.bf16.mxu0 %v1905_v0 }
 0x45e   : > { %v1591_v6 = vpop.eup %1590 }
 0x45f   : > { %v982_v7 = vmul.f32 %v1591_v6, %v1587_v59 }
 0x461   : > { %v983_v9 = vpack.c.bf16 %v982_v7, %v982_v7 }
 0x463   : > { %1448 = vmatmul.mubr.msk.bf16.vlgmr.msra.gmra.mrb[12].mxu0 %vm856_vm4, %v983_v9 }
 0x464   : > { %1458 = vmatpush3.bf16.msra.mxu0 %v1582_v8  ;;  %1459 = vmatprep.mubr.msk.bf16.mxu0 %vm1906_vm0, %v1905_v0 }
 0x4c3   : > { %v910_v10 = vpop.f32.mrb[8].mxu0 }
 0x4c4   : > { %v916_v11 = vpack.c.bf16 %v910_v10, %v910_v10  ;;  %v1437_v12 = vpop.f32.mrb[9].mxu0 }
 0x4c5   : > { %v913_v13 = vpop.f32.mrb[10].mxu0 }
 0x4c6   : > { %v1438_v14 = vpop.f32.mrb[11].mxu0  ;;  %1460 = vmatmul.mubr.msk.bf16.vlgmr.msra.gmra.mrb[16].mxu0 %vm808_vm2, %v916_v11 }
 0x536   : > { %v1027_v15 = vpop.f32.mrb[12].mxu0 }
 0x537   : > { %v1033_v16 = vpack.c.bf16 %v1027_v15, %v1027_v15  ;;  %v1449_v17 = vpop.f32.mrb[13].mxu0 }
 0x538   : > { %v1030_v18 = vpop.f32.mrb[14].mxu0 }
 0x539   : > { %v1450_v19 = vpop.f32.mrb[15].mxu0  ;;  %1454 = vmatmul.mubr.msk.bf16.vlgmr.msra.gmra.mrb[12].mxu1 %vm808_vm2, %v1033_v16 }
 0x599   : > { %v1128_v20 = vpop.f32.mrb[16].mxu0 }
 0x59a   : > { %v1461_v21 = vpop.f32.mrb[17].mxu0 }
 0x59b   : > { %v1131_v22 = vpop.f32.mrb[18].mxu0 }
 0x59c   : > { %v1462_v0 = vpop.f32.mrb[19].mxu0 }
 0x60c   : > { %v1079_v23 = vpop.f32.mrb[12].mxu1 }
 0x60d   : > { %v1129_v25 = vadd.f32 %v1128_v20, %v1079_v23  ;;  %v1455_v26 = vpop.f32.mrb[13].mxu1 }
 0x60e   : > { %v1082_v27 = vpop.f32.mrb[14].mxu1 }
 0x60f   : > { %v1141_v28 = vadd.f32 %v1377_v24, %v1129_v25  ;;  %v1456_v29 = vpop.f32.mrb[15].mxu1 }
 0x611   : > { %1142 = vst.msk [vmem:[%s597_s20] sm:$0xff] %vm629_vm1, %v1141_v28 }
 0x612   : > { %1809 = shalt.err (!%p1806_p7)
}
 0x613   : > { %s1810_s24 = scalar_lea.hbm %s2386_s4, 128  ;;  %s1814_s13 = scalar_lea.hbm %s2512_s16, 256 }
 0x614   : > { %p1811_p10 = scmp.ne.s32.totalorder %s2386_s4, %s1810_s24  ;;  %p1815_p4 = scmp.lt.u32.totalorder %s2386_s4, %s2512_s16 }
 0x615   : > { %p1816_p2 = scmp.lt.u32.totalorder %s1814_s13, %s1810_s24  ;;  %p1818_p13 = scmp.lt.u32.totalorder %s1810_s24, %s2386_s4 }
 0x616   : > { %p1812_p6 = pnand %p1811_p10, %p2513_p12 }
 0x617   : > { %p1817_p8 = por %p1816_p2, %p1815_p4 }
 0x618   : > { %p1813_p1 = pneg %p1812_p6 }
 0x619   : > { %p1819_p3 = por %p1818_p13, %p1817_p8 }
 0x61b   : > { %p1820_p0 = pnand %p1819_p3, %p1813_p1 }
 0x61d   : > { %1823 = shalt.err (!%p1820_p0)
}
 0x61e   : > { %1483 = dma.vmem_to_hbm [thread:$0]  (%p2513_p12), %s2388_s8, 128, %s2386_s4, %s1144_s10  }
 0x61f PF: > { %s2514_s28 = sld [smem:[#allocation21_spill]]  ;;  %s2515_s17 = sld [smem:[#allocation24_spill]] }
 0x620   : > { %p2517_p9 = scmp.ge.s32.totalorder %s1894_s26, 2 }
 0x625   : > { %s1170_s7 = sand.u32 1, %s2514_s28   ;;  %p2516_p11 = scmp.ne.s32.totalorder %s2515_s17, 0 }
 0x626   : > { %s1171_s29 = scalar_lea.sflag [#allocation4], %s1170_s7 }
 0x627   : > { %p1509_p5 = pnand %p2517_p9, %p2516_p11 }
 0x629   : > { %1869 = dma.done.wait (!%p1509_p5), %s1171_s29, 128  }
 0x62a   : > { %1871 = vsyncadd (!%p1509_p5), %s1171_s29, 4294967168  ;;  %s35_s26 = sadd.s32 1, %s1894_s26   ;;  %s2518_s20 = sld [smem:[#allocation22_spill]] }
 0x62b   : > { %p32_p7 = scmp.ge.s32.totalorder %s35_s26, 4   ;;  %s2519_s23 = sld [smem:[#allocation27_spill]] }
 0x62c   : > { %s2520_s12 = sld [smem:[#allocation25_spill]]  ;;  %s2521_s21 = smov %s1878_s22 }
 0x62d   : > { %s2523_s24 = smov %s1890_s25  ;;  %34 = sbr.rel (!%p32_p7) target bundleno = 20 (0x14), region = 162 }
 0x630   : > { %s2522_s22 = smov %s2518_s20 }
 0x632   : > { %s2524_s25 = smov %s2520_s12 }
 0x634   :  { %1176 = vsyncpa [#allocation3], 1 }
 0x635   :  { %1178 = vsyncpa [#allocation3 + $0x1], 1 }
 0x636   :  { %1179 = vsyncpa [#allocation6], 1 }
 0x637   :  { %1181 = vsyncpa [#allocation6 + $0x1], 1 }
 0x638   :  { %1182 = vsyncpa [#allocation9], 1 }
 0x639   :  { %1184 = vsyncpa [#allocation9 + $0x1], 1 }
 0x63a   :  { %1185 = vsyncpa [#allocation12], 1 }
 0x63b   :  { %1186 = vsyncpa [#allocation4], 1 }
 0x63c   :  { %1188 = vsyncpa [#allocation4 + $0x1], 1 }

</bundles_post_ra>
